<compile_context>
chip_gen: v5e
topology: v5e:2x2
jax: 0.10.0
libtpu: 0.0.40
codegen_flags: <defaults>
</compile_context>

<pallas_src>
import math
from functools import partial

import jax
import jax.numpy as jnp
from jax.experimental import pallas as pl
from jax.experimental.pallas import tpu as pltpu

INV_LN10 = 1.0 / math.log(10.0)
_LANE = 128
_MAX_TILE = 8192


def _round_up(v, m):
    return ((v + m - 1) // m) * m


def _mlp_kernel(layer_modes, *refs):
    """refs = (x_ref, W1, b1, W2, b2, ..., Wn, bn, out_ref).

    Activations are [features, batch_tile]; batch is on the 128-lane axis.
    """
    x_ref = refs[0]
    param_refs = refs[1:-1]
    out_ref = refs[-1]
    n_layers = len(layer_modes)

    # log10(x) -- lane-dense EUP/VPU work on the [in_dim, bt] block.
    h = jnp.log(x_ref[...]) * INV_LN10

    for layer, mode in enumerate(layer_modes):
        w = param_refs[2 * layer][...]
        b = param_refs[2 * layer + 1][...]          # [n_out, 1]
        if mode == "fma":
            # Tiny contraction dim (n_in <= 8): unrolled broadcast-FMA on the VPU.
            z = w[:, 0:1] * h[0:1, :]
            for k in range(1, w.shape[1]):
                z = z + w[:, k:k + 1] * h[k:k + 1, :]
            z = z + b
        elif mode == "reduce":
            # 1-wide output; w was pre-transposed on the host to [n_in, 1]:
            # elementwise multiply + sublane reduce (XLU), no MXU round-trip
            # and no per-step in-kernel weight transpose.
            z = jnp.sum(w * h, axis=0, keepdims=True) + b
        else:  # "mxu"
            # Full-width layer: MXU matmul, f32 accumulate, reference parity.
            z = jnp.dot(w, h, preferred_element_type=jnp.float32,
                        precision=jax.lax.Precision.HIGHEST) + b
        if layer < n_layers - 1:
            h = jnp.tanh(z)                          # self.activation
        else:
            h = jax.nn.softplus(z)                   # self.final_activation
    out_ref[...] = h.astype(out_ref.dtype)


def _pick_tile(B, batch_tile):
    """Lane-dense batch tile derived from B; >= 2 (preferably even) grid steps."""
    if batch_tile is not None:
        bt = max(_LANE, (int(batch_tile) // _LANE) * _LANE)
        return bt, pl.cdiv(B, bt)
    min_steps = 2 if B > _LANE else 1                # keep both v7x TCs busy
    steps = max(min_steps, pl.cdiv(B, _MAX_TILE))
    if steps > 1 and steps % 2:
        steps += 1                                   # even step count for 2-TC balance
    bt = _round_up(pl.cdiv(B, steps), _LANE)
    return bt, pl.cdiv(B, bt)


def fully_connected_network(x, params, *, batch_tile=None):
    """x: [B, num_nodes[0]] float32 (strictly positive).
    params: list of (W [n_out, n_in], b [n_out, 1]) per Linear layer (PyTorch layout).
    Returns [B, num_nodes[-1]]."""
    B, in_dim = x.shape
    out_dim = params[-1][0].shape[0]
    bt, grid_n = _pick_tile(B, batch_tile)

    # Batch on the lane axis: kernel activations are [features, batch].
    # TODO(synk): fold this transpose away (see header note).
    x_t = x.T                                        # [in_dim, B]

    modes = []
    flat_params = []
    in_specs = [pl.BlockSpec((in_dim, bt), lambda i: (0, i))]
    for w, b in params:
        n_out, n_in = w.shape
        if n_in <= 8:
            modes.append("fma")
        elif n_out == 1:
            modes.append("reduce")
            w = w.T                                  # host-side pre-transpose -> [n_in, 1]
        else:
            modes.append("mxu")
        flat_params.extend([w, b])
        # Weights/biases: full-array blocks, constant index_map -> DMA'd once,
        # VMEM-resident across all grid steps.
        in_specs.append(pl.BlockSpec(w.shape, lambda i: (0, 0)))
        in_specs.append(pl.BlockSpec(b.shape, lambda i: (0, 0)))
    out_spec = pl.BlockSpec((out_dim, bt), lambda i: (0, i))

    layer_dims = [(w.shape[1], w.shape[0]) for w, _ in params]   # (n_in, n_out)
    hidden_sum = sum(n_out for (_, n_out) in layer_dims[:-1])
    param_bytes = sum(w.size * w.dtype.itemsize + b.size * b.dtype.itemsize
                      for w, b in params)
    cost = pl.CostEstimate(
        flops=2 * B * sum(n_in * n_out for n_in, n_out in layer_dims),
        transcendentals=B * (in_dim + hidden_sum + 2 * out_dim),
        bytes_accessed=B * (in_dim + out_dim) * 4 + param_bytes,
    )

    out_t = pl.pallas_call(
        partial(_mlp_kernel, tuple(modes)),
        out_shape=jax.ShapeDtypeStruct((out_dim, B), x.dtype),   # exact B: no pad
        grid_spec=pltpu.PrefetchScalarGridSpec(
            num_scalar_prefetch=0,
            grid=(grid_n,),
            in_specs=in_specs,
            out_specs=out_spec,
        ),
        compiler_params=pltpu.CompilerParams(
            dimension_semantics=("parallel",)),
        cost_estimate=cost,
    )(x_t, *flat_params)

    return out_t.T                                   # back to [B, out_dim]


def init_params(key, num_nodes):
    """Deterministic init mimicking nn.Linear (uniform +-1/sqrt(fan_in)), PyTorch layout."""
    params = []
    for n_in, n_out in zip(num_nodes[:-1], num_nodes[1:]):
        key, kw, kb = jax.random.split(key, 3)
        bound = 1.0 / math.sqrt(n_in)
        w = jax.random.uniform(kw, (n_out, n_in), jnp.float32, -bound, bound)
        b = jax.random.uniform(kb, (n_out, 1), jnp.float32, -bound, bound)
        params.append((w, b))
    return params


def reference_forward(x, params):
    h = jnp.log10(x)
    for i, (w, b) in enumerate(params):
        h = jnp.dot(h, w.T, precision=jax.lax.Precision.HIGHEST) + b[:, 0]
        if i < len(params) - 1:
            h = jnp.tanh(h)
    return jax.nn.softplus(h)


if __name__ == "__main__":
    num_nodes = [4, 32, 32, 1]   # FullyConnectedNetwork(num_nodes, activation=tanh)
    batch = 500                  # ragged on purpose: auto tile -> bt=256, grid=2

    key = jax.random.PRNGKey(0)
    key, kx = jax.random.split(key)
    # strictly positive inputs (forward takes log10 of x)
    x = jax.random.uniform(kx, (batch, num_nodes[0]), jnp.float32, 0.1, 10.0)

    params = init_params(key, num_nodes)

    out = fully_connected_network(x, params)
    out = jax.block_until_ready(out)

    ref = reference_forward(x, params)
    assert out.shape == (batch, num_nodes[-1])
    assert jnp.allclose(out, ref, atol=1e-5, rtol=1e-5), "mismatch vs JAX reference"

    print("KERNEL_OK")
</pallas_src>

<mosaic_0001>
module attributes {stable_mosaic.version = 11 : i64} {
  func.func @_mlp_kernel(%arg0: i32, %arg1: memref<4x256xf32, #tpu.memory_space<vmem>>, %arg2: memref<32x4xf32, #tpu.memory_space<vmem>>, %arg3: memref<32x1xf32, #tpu.memory_space<vmem>>, %arg4: memref<32x32xf32, #tpu.memory_space<vmem>>, %arg5: memref<32x1xf32, #tpu.memory_space<vmem>>, %arg6: memref<32x1xf32, #tpu.memory_space<vmem>>, %arg7: memref<1x1xf32, #tpu.memory_space<vmem>>, %arg8: memref<1x256xf32, #tpu.memory_space<vmem>>) attributes {dimension_semantics = [#tpu.dimension_semantics<parallel>], iteration_bounds = array<i64: 2>, scalar_prefetch = 0 : i64, scratch_operands = 0 : i64, tpu.core_type = #tpu.core_type<tc>, window_params = [{transform_indices = @transform_0, window_bounds = array<i64: 4, 256>}, {pipeline_mode = #tpu.pipeline_mode<synchronous>, transform_indices = @transform_1, window_bounds = array<i64: 32, 4>}, {pipeline_mode = #tpu.pipeline_mode<synchronous>, transform_indices = @transform_2, window_bounds = array<i64: 32, 1>}, {pipeline_mode = #tpu.pipeline_mode<synchronous>, transform_indices = @transform_3, window_bounds = array<i64: 32, 32>}, {pipeline_mode = #tpu.pipeline_mode<synchronous>, transform_indices = @transform_4, window_bounds = array<i64: 32, 1>}, {pipeline_mode = #tpu.pipeline_mode<synchronous>, transform_indices = @transform_5, window_bounds = array<i64: 32, 1>}, {pipeline_mode = #tpu.pipeline_mode<synchronous>, transform_indices = @transform_6, window_bounds = array<i64: 1, 1>}, {transform_indices = @transform_7, window_bounds = array<i64: 1, 256>}]} {
    %c0 = arith.constant 0 : index
    %c0_0 = arith.constant 0 : index
    %0 = vector.load %arg1[%c0, %c0_0] : memref<4x256xf32, #tpu.memory_space<vmem>>, vector<4x256xf32>
    %1 = math.log %0 : vector<4x256xf32>
    %cst = arith.constant 0.434294492 : f32
    %2 = vector.broadcast %cst : f32 to vector<4x256xf32>
    %3 = arith.mulf %1, %2 : vector<4x256xf32>
    %c0_1 = arith.constant 0 : index
    %c0_2 = arith.constant 0 : index
    %4 = vector.load %arg2[%c0_1, %c0_2] : memref<32x4xf32, #tpu.memory_space<vmem>>, vector<32x4xf32>
    %c0_3 = arith.constant 0 : index
    %c0_4 = arith.constant 0 : index
    %5 = vector.load %arg3[%c0_3, %c0_4] : memref<32x1xf32, #tpu.memory_space<vmem>>, vector<32x1xf32>
    %6 = vector.extract_strided_slice %4 {offsets = [0, 0], sizes = [32, 1], strides = [1, 1]} : vector<32x4xf32> to vector<32x1xf32>
    %7 = vector.extract_strided_slice %3 {offsets = [0, 0], sizes = [1, 256], strides = [1, 1]} : vector<4x256xf32> to vector<1x256xf32>
    %8 = vector.broadcast %6 : vector<32x1xf32> to vector<32x256xf32>
    %9 = vector.broadcast %7 : vector<1x256xf32> to vector<32x256xf32>
    %10 = arith.mulf %8, %9 : vector<32x256xf32>
    %11 = vector.extract_strided_slice %4 {offsets = [0, 1], sizes = [32, 1], strides = [1, 1]} : vector<32x4xf32> to vector<32x1xf32>
    %12 = vector.extract_strided_slice %3 {offsets = [1, 0], sizes = [1, 256], strides = [1, 1]} : vector<4x256xf32> to vector<1x256xf32>
    %13 = vector.broadcast %11 : vector<32x1xf32> to vector<32x256xf32>
    %14 = vector.broadcast %12 : vector<1x256xf32> to vector<32x256xf32>
    %15 = arith.mulf %13, %14 : vector<32x256xf32>
    %16 = arith.addf %10, %15 : vector<32x256xf32>
    %17 = vector.extract_strided_slice %4 {offsets = [0, 2], sizes = [32, 1], strides = [1, 1]} : vector<32x4xf32> to vector<32x1xf32>
    %18 = vector.extract_strided_slice %3 {offsets = [2, 0], sizes = [1, 256], strides = [1, 1]} : vector<4x256xf32> to vector<1x256xf32>
    %19 = vector.broadcast %17 : vector<32x1xf32> to vector<32x256xf32>
    %20 = vector.broadcast %18 : vector<1x256xf32> to vector<32x256xf32>
    %21 = arith.mulf %19, %20 : vector<32x256xf32>
    %22 = arith.addf %16, %21 : vector<32x256xf32>
    %23 = vector.extract_strided_slice %4 {offsets = [0, 3], sizes = [32, 1], strides = [1, 1]} : vector<32x4xf32> to vector<32x1xf32>
    %24 = vector.extract_strided_slice %3 {offsets = [3, 0], sizes = [1, 256], strides = [1, 1]} : vector<4x256xf32> to vector<1x256xf32>
    %25 = vector.broadcast %23 : vector<32x1xf32> to vector<32x256xf32>
    %26 = vector.broadcast %24 : vector<1x256xf32> to vector<32x256xf32>
    %27 = arith.mulf %25, %26 : vector<32x256xf32>
    %28 = arith.addf %22, %27 : vector<32x256xf32>
    %29 = vector.broadcast %5 : vector<32x1xf32> to vector<32x256xf32>
    %30 = arith.addf %28, %29 : vector<32x256xf32>
    %31 = math.tanh %30 : vector<32x256xf32>
    %c0_5 = arith.constant 0 : index
    %c0_6 = arith.constant 0 : index
    %32 = vector.load %arg4[%c0_5, %c0_6] : memref<32x32xf32, #tpu.memory_space<vmem>>, vector<32x32xf32>
    %c0_7 = arith.constant 0 : index
    %c0_8 = arith.constant 0 : index
    %33 = vector.load %arg5[%c0_7, %c0_8] : memref<32x1xf32, #tpu.memory_space<vmem>>, vector<32x1xf32>
    %cst_9 = arith.constant dense<0.000000e+00> : vector<32x256xf32>
    %34 = tpu.matmul %32, %31, %cst_9 {dimension_numbers = #tpu.dot_dimension_numbers<[1], [0], [0], [1], [0, 0, 1, 1], [], []>, precision = #tpu.contract_precision<fp32>} : vector<32x32xf32>, vector<32x256xf32>, vector<32x256xf32> -> vector<32x256xf32>
    %35 = vector.broadcast %33 : vector<32x1xf32> to vector<32x256xf32>
    %36 = arith.addf %34, %35 : vector<32x256xf32>
    %37 = math.tanh %36 : vector<32x256xf32>
    %c0_10 = arith.constant 0 : index
    %c0_11 = arith.constant 0 : index
    %38 = vector.load %arg6[%c0_10, %c0_11] : memref<32x1xf32, #tpu.memory_space<vmem>>, vector<32x1xf32>
    %c0_12 = arith.constant 0 : index
    %c0_13 = arith.constant 0 : index
    %39 = vector.load %arg7[%c0_12, %c0_13] : memref<1x1xf32, #tpu.memory_space<vmem>>, vector<1x1xf32>
    %40 = vector.broadcast %38 : vector<32x1xf32> to vector<32x256xf32>
    %41 = arith.mulf %40, %37 : vector<32x256xf32>
    %cst_14 = arith.constant dense<0.000000e+00> : vector<256xf32>
    %42 = vector.multi_reduction <add>, %41, %cst_14 [0] : vector<32x256xf32> to vector<256xf32>
    %43 = vector.shape_cast %42 : vector<256xf32> to vector<1x256xf32>
    %44 = vector.broadcast %39 : vector<1x1xf32> to vector<1x256xf32>
    %45 = arith.addf %43, %44 : vector<1x256xf32>
    %cst_15 = arith.constant 0.000000e+00 : f32
    %46 = vector.broadcast %cst_15 : f32 to vector<1x256xf32>
    %47 = arith.maximumf %45, %46 : vector<1x256xf32>
    %48 = vector.broadcast %cst_15 : f32 to vector<1x256xf32>
    %49 = arith.subf %45, %48 : vector<1x256xf32>
    %50 = arith.cmpf one, %49, %49 : vector<1x256xf32>
    %51 = vector.broadcast %cst_15 : f32 to vector<1x256xf32>
    %52 = arith.addf %45, %51 : vector<1x256xf32>
    %53 = math.absf %49 : vector<1x256xf32>
    %cst_16 = arith.constant 0.000000e+00 : f32
    %54 = vector.broadcast %cst_16 : f32 to vector<1x256xf32>
    %55 = arith.subf %54, %53 : vector<1x256xf32>
    %56 = math.exp %55 : vector<1x256xf32>
    %57 = math.log1p %56 : vector<1x256xf32>
    %58 = arith.addf %47, %57 : vector<1x256xf32>
    %59 = arith.select %50, %52, %58 : vector<1x256xi1>, vector<1x256xf32>
    %c0_17 = arith.constant 0 : index
    %c0_18 = arith.constant 0 : index
    %60 = vector.load %arg8[%c0_17, %c0_18] : memref<1x256xf32, #tpu.memory_space<vmem>>, vector<1x256xf32>
    tpu.vector_store %arg8[%c0_17, %c0_18], %59 {strides = array<i32>} : memref<1x256xf32, #tpu.memory_space<vmem>>, vector<1x256xf32>,
    return
  }
  func.func @transform_0(%arg0: i32) -> (i32, i32) {
    %c0_i32 = arith.constant 0 : i32
    %c0_i32_0 = arith.constant 0 : i32
    return %c0_i32, %arg0 : i32, i32
  }
  func.func @transform_1(%arg0: i32) -> (i32, i32) {
    %c0_i32 = arith.constant 0 : i32
    %c0_i32_0 = arith.constant 0 : i32
    %c0_i32_1 = arith.constant 0 : i32
    return %c0_i32, %c0_i32_0 : i32, i32
  }
  func.func @transform_2(%arg0: i32) -> (i32, i32) {
    %c0_i32 = arith.constant 0 : i32
    %c0_i32_0 = arith.constant 0 : i32
    %c0_i32_1 = arith.constant 0 : i32
    return %c0_i32, %c0_i32_0 : i32, i32
  }
  func.func @transform_3(%arg0: i32) -> (i32, i32) {
    %c0_i32 = arith.constant 0 : i32
    %c0_i32_0 = arith.constant 0 : i32
    %c0_i32_1 = arith.constant 0 : i32
    return %c0_i32, %c0_i32_0 : i32, i32
  }
  func.func @transform_4(%arg0: i32) -> (i32, i32) {
    %c0_i32 = arith.constant 0 : i32
    %c0_i32_0 = arith.constant 0 : i32
    %c0_i32_1 = arith.constant 0 : i32
    return %c0_i32, %c0_i32_0 : i32, i32
  }
  func.func @transform_5(%arg0: i32) -> (i32, i32) {
    %c0_i32 = arith.constant 0 : i32
    %c0_i32_0 = arith.constant 0 : i32
    %c0_i32_1 = arith.constant 0 : i32
    return %c0_i32, %c0_i32_0 : i32, i32
  }
  func.func @transform_6(%arg0: i32) -> (i32, i32) {
    %c0_i32 = arith.constant 0 : i32
    %c0_i32_0 = arith.constant 0 : i32
    %c0_i32_1 = arith.constant 0 : i32
    return %c0_i32, %c0_i32_0 : i32, i32
  }
  func.func @transform_7(%arg0: i32) -> (i32, i32) {
    %c0_i32 = arith.constant 0 : i32
    %c0_i32_0 = arith.constant 0 : i32
    return %c0_i32, %arg0 : i32, i32
  }
}

</mosaic_0001>

<bundles_post_ra>
// kernel: tpu_custom_call.1
= control target key start
LH: loop header
LB: loop body
LE: loop exit
PB: predicated region body
PF: predicated region fallthrough
CT: control target
= control target key end

     0   :  { %s1895_s0 = inlined_call_operand.vmem [shape: f32[4,500], index: 0, kind: input, shape index: {}]   ;;  %s1896_s1 = inlined_call_operand.vmem [shape: f32[32,4], index: 1, kind: input, shape index: {}]   ;;  %s1897_s2 = inlined_call_operand.vmem [shape: f32[32,1], index: 2, kind: input, shape index: {}]   ;;  %s1898_s3 = inlined_call_operand.vmem [shape: f32[32,32], index: 3, kind: input, shape index: {}]   ;;  %s1899_s4 = inlined_call_operand.vmem [shape: f32[32,1], index: 4, kind: input, shape index: {}]   ;;  %s1900_s5 = inlined_call_operand.vmem [shape: f32[32,1], index: 5, kind: input, shape index: {}]   ;;  %s1901_s6 = inlined_call_operand.<no memory space> [shape: f32[1,1], index: 6, kind: input, shape index: {}]   ;;  %s1902_s7 = inlined_call_operand.hbm [shape: f32[1,500], index: 7, kind: output, shape index: {}]  }
   0x1   :  { %v12_v0 = vstv %s1901_s6 }
   0x2   :  { %13 = vst [vmem:[#allocation2] sm:$0x1] %v12_v0 }
   0x3   :  { %14 = vsyncpa [#allocation4], 0 }
   0x4   :  { %16 = vsyncpa [#allocation4 + $0x1], 0  ;;  %s1489_s26 = smov 0   ;;  %s1491_s27 = smov 0  }
   0x5   :  { %s1493_s28 = smov 0   ;;  %s1495_s29 = smov 0  }
   0x6 LB: > { %s1264_s6 = sadd.s32 4294967295, %s1440_s29   ;;  %s1265_s30 = sadd.s32 4294967294, %s1440_s29   ;;  %s1440_s29 = sphi %s1495_s29, %s1908_s29   ;;  %s1436_s28 = sphi %s1493_s28, %s1907_s28   ;;  %s1432_s27 = sphi %s1491_s27, %s1906_s27   ;;  %s1428_s26 = sphi %s1489_s26, %s1905_s26  }
   0x7   : > { %s1512_s8 = sadd.s32 1, %s1440_s29   ;;  %s181_s9 = sadd.s32 1, %s1436_s28 }
   0x8   : > { %s178_s10 = ssub.s32 %s1440_s29, %s1512_s8  ;;  %p191_p0 = scmp.ne.s32.totalorder %s1436_s28, %s1432_s27 }
   0x9   : > { %p179_p1 = scmp.eq.s32.totalorder %s178_s10, 0  ;;  %p192_p2 = scmp.eq.s32.totalorder %s1264_s6, 1 }
   0xa   : > { %p197_p3 = scmp.ne.s32.totalorder %s1432_s27, %s1428_s26  ;;  %p198_p4 = scmp.eq.s32.totalorder %s1265_s30, 1 }
   0xb   : > { %s1524_s11 = scalar_select %p179_p1, %s1436_s28, %s181_s9  }
   0xc   : > { %p1526_p5 = por %p192_p2, %p191_p0  ;;  %p1530_p6 = por %p198_p4, %p197_p3 }
   0xd   : > { %p1268_p7 = scmp.ge.s32.totalorder %s1440_s29, 1  ;;  %p243_p8 = scmp.lt.s32.totalorder %s1440_s29, 3 }
   0xf   : > { %p244_p9 = pnand %p1268_p7, %p243_p8 }
  0x10   : > { %s1586_s16 = sshll.u32 (!%p244_p9), %s1264_s6, 1  ;;  %s272_s14 = sand.u32 (!%p244_p9), 1, %s1432_s27  }
  0x11   : > { %247 = sbr.rel (%p244_p9) target bundleno = 505 (0x1f9), region = 48  ;;  %p276_p10 = scmp.lt.s32.totalorder (!%p244_p9), %s1586_s16, 3 }
  0x12   : > { %s1269_s15 = sshll.u32 (!%p244_p9), %s272_s14, 1  ;;  %s1201_s19 = scalar_lea.hbm (!%p244_p9), %s1902_s7, %s1586_s16 }
  0x13   : > { %s274_s20 = scalar_lea.vmem (!%p244_p9), [#allocation3], %s1269_s15  ;;  %s1205_s6 = sshll.u32 (!%p244_p9), %s1201_s19, 4  ;;  %s1206_s6 = int_to_ptr.hbm [resolvable:$true] %s1205_s6 }
  0x14   : > { %s1392_s22 = sshra.s32 (!%p244_p9), %s1206_s6, 4  ;;  %s1398_s30 = scalar_lea.hbm (!%p244_p9), %s1902_s7, 4  ;;  %s1393_s22 = int_to_ptr.hbm [resolvable:$true] %s1392_s22 }
  0x15   : > { %s1394_s23 = scalar_lea.hbm (!%p244_p9), %s1393_s22, 2  ;;  %p1399_p0 = scmp.lt.s32.totalorder (!%p244_p9), %s1393_s22, %s1902_s7 }
  0x16   : > { %v289_v1 = vld [vmem:[%s1896_s1 + $0x18] sm:$0xff]  ;;  %v288_v2 = vld [vmem:[%s1896_s1 + $0x10] sm:$0xff]  ;;  %v1442_v3 = vmov 2   ;;  %v1443_v4 = vmov 0   ;;  %v287_v5 = vld [vmem:[%s1896_s1 + $0x8] sm:$0xff]  ;;  %v1444_v6 = vmov 1   ;;  %p1395_p11 = scmp.ne.s32.totalorder %s1393_s22, %s1394_s23  ;;  %p1400_p1 = scmp.lt.s32.totalorder %s1398_s30, %s1394_s23 }
  0x17   : > { %1323 = vset.pattern.permute.xlu2 %v1442_v3  ;;  %1321 = vset.pattern.permute.xlu1 %v1443_v4  ;;  %v1445_v7 = vmov 3   ;;  %v286_v8 = vld [vmem:[%s1896_s1] sm:$0xff]  ;;  %v291_v9 = vld [vmem:[%s1897_s2 + $0x8] sm:$0xff]  ;;  %v486_v10 = vld [vmem:[%s1899_s4 + $0x18] sm:$0xff]  ;;  %s277_s17 = scalar_select %p276_p10, %s1586_s16, 3  ;;  %vm507_vm0 = vcmask 261120  }
  0x18   : > { %1319 = vset.pattern.permute.xlu0 %v1443_v4  ;;  %380 = vperm.xlu2 %1323, %v289_v1   ;;  %v293_v11 = vld [vmem:[%s1897_s2 + $0x18] sm:$0xff]  ;;  %v1086_v12 = vld [vmem:[%s1900_s5 + $0x10] sm:$0xff]  ;;  %v290_v14 = vld [vmem:[%s1897_s2] sm:$0xff]  ;;  %vm1182_vm4 = vcmask 1040384   ;;  %s1191_s16 = scalar_lea.sflag [#allocation4], %s272_s14  ;;  %p1396_p12 = pnand %p1395_p11, %p1526_p5 }
  0x19   : > { %311 = vperm.xlu0 %1319, %v289_v1   ;;  %306 = vperm.xlu1 %1321, %v288_v2   ;;  %v292_v13 = vld [vmem:[%s1897_s2 + $0x10] sm:$0xff]  ;;  %v483_v15 = vld [vmem:[%s1899_s4] sm:$0xff]  ;;  %v484_v16 = vld [vmem:[%s1899_s4 + $0x8] sm:$0xff]  ;;  %s1271_s18 = sshll.u32 %s277_s17, 2  ;;  %p1401_p2 = por %p1400_p1, %p1399_p0 }
  0x1a   : > { %v485_v17 = vld [vmem:[%s1899_s4 + $0x10] sm:$0xff]  ;;  %v1084_v18 = vld [vmem:[%s1900_s5] sm:$0xff]  ;;  %v1085_v19 = vld [vmem:[%s1900_s5 + $0x8] sm:$0xff]  ;;  %s279_s21 = scalar_lea.vmem %s1895_s0, %s1271_s18  ;;  %p1397_p13 = pneg %p1396_p12 }
  0x1b   : > { %v1087_v20 = vld [vmem:[%s1900_s5 + $0x18] sm:$0xff]  ;;  %v1088_v21 = vld [vmem:[#allocation2] sm:$0x1] }
  0x1c   : > { %v282_v23 = vld [vmem:[%s279_s21] sm:$0xff]  ;;  %s1203_s21 = sshll.u32 %s274_s20, 4  ;;  %p1402_p3 = pnand %p1401_p2, %p1397_p13  ;;  %s1204_s21 = int_to_ptr.vmem [resolvable:$true] %s1203_s21 }
  0x1d   : > { %1336 = vlog2.f32 %v282_v23 }
  0x20   : > { %1324 = vset.pattern.permute.xlu2 %v1443_v4 }
  0x21   : > { %1320 = vset.pattern.permute.xlu0 %v1444_v6  ;;  %1322 = vset.pattern.permute.xlu1 %v1444_v6 }
  0x22   : > { %342 = vperm.xlu0 %1320, %v289_v1   ;;  %338 = vperm.xlu1 %1322, %v288_v2  }
  0x23   : > { %301 = vperm.xlu2 %1324, %v287_v5   ;;  %v1337_v25 = vpop.eup %1336 }
  0x24   : > { %v284_v27 = vmul.f32 0.6931472, %v1337_v25 }
  0x26   : > { %v285_v30 = vmul.f32 0.4342945, %v284_v27 }
  0x28   : > { %v345_v31 = vperm.slane %v285_v30, 1  ;;  %v315_v33 = vperm.slane %v285_v30, 0  ;;  %v383_v35 = vperm.slane %v285_v30, 2  ;;  %v421_v43 = vperm.slane %v285_v30, 3 }
  0x29   : > { %v346_v53 = vperm.slane %v285_v30, 5  ;;  %v316_v57 = vperm.slane %v285_v30, 4  ;;  %v384_v61 = vperm.slane %v285_v30, 6 }
  0x2a   : > { %1326 = vset.pattern.permute.xlu0 %v1445_v7  ;;  %334 = vperm.xlu1 %1322, %v287_v5   ;;  %v1597_v34 = vperm.slane %v345_v31, 1  ;;  %v1599_v36 = vperm.slane %v315_v33, 0  ;;  %v1603_v41 = vperm.slane %v383_v35, 2  ;;  %v1607_v47 = vperm.slane %v421_v43, 3 }
  0x2b   : > { %1325 = vset.pattern.permute.xlu2 %v1442_v3  ;;  %418 = vperm.xlu0 %1326, %v289_v1   ;;  %v1612_v60 = vperm.slane %v346_v53, 1  ;;  %v1615_v0 = vperm.slane %v316_v57, 0  ;;  %v479_v57 = vld [vmem:[%s1898_s3] sm:$0xff] }
  0x2c   : > { %376 = vperm.xlu2 %1325, %v288_v2  }
  0x32   : > { %1327 = vset.pattern.permute.xlu1 %v1443_v4 }
  0x33   : > { %296 = vperm.xlu1 %1327, %v286_v8   ;;  %1331 = vset.pattern.permute.xlu0 %v1442_v3 }
  0x34   : > { %1328 = vset.pattern.permute.xlu2 %v1444_v6  ;;  %368 = vperm.xlu0 %1331, %v286_v8  }
  0x35   : > { %330 = vperm.xlu2 %1328, %v286_v8  }
  0x3b   : > { %1329 = vset.pattern.permute.xlu1 %v1442_v3 }
  0x3c   : > { %372 = vperm.xlu1 %1329, %v287_v5   ;;  %1334 = vset.pattern.permute.xlu0 %v1443_v4 }
  0x3d   : > { %1330 = vset.pattern.permute.xlu2 %v1445_v7  ;;  %450 = vperm.xlu0 %1334, %v291_v9  }
  0x3e   : > { %414 = vperm.xlu2 %1330, %v288_v2  }
  0x44   : > { %1332 = vset.pattern.permute.xlu1 %v1445_v7 }
  0x45   : > { %410 = vperm.xlu1 %1332, %v287_v5   ;;  %504 = vperm.xlu0 %1334, %v486_v10   ;;  %v1621_v5 = vperm.slane %v384_v61, 2 }
  0x46   : > { %1333 = vset.pattern.permute.xlu2 %v1443_v4 }
  0x47   : > { %460 = vperm.xlu2 %1333, %v293_v11  }
  0x4d   : > { %406 = vperm.xlu1 %1332, %v286_v8   ;;  %1101 = vperm.xlu0 %1334, %v1086_v12  }
  0x4f   : > { %455 = vperm.xlu2 %1333, %v292_v13  }
  0x55   : > { %1335 = vset.pattern.permute.xlu1 %v1443_v4  ;;  %v422_v4 = vperm.slane %v285_v30, 7 }
  0x56   : > { %445 = vperm.xlu1 %1335, %v290_v14  }
  0x57   : > { %489 = vperm.xlu2 %1333, %v483_v15   ;;  %v1625_v13 = vperm.slane %v422_v4, 3 }
  0x5e   : > { %494 = vperm.xlu1 %1335, %v484_v16  }
  0x5f   : > { %499 = vperm.xlu2 %1333, %v485_v17  }
  0x66   : > { %1091 = vperm.xlu1 %1335, %v1084_v18  }
  0x67   : > { %1096 = vperm.xlu2 %1333, %v1085_v19  }
  0x6e   : > { %1106 = vperm.xlu1 %1335, %v1087_v20  }
  0x6f   : > { %1137 = vperm.xlu2 %1333, %v1088_v21  }
  0x72   : > { %v381_v22 = vpop.permute.xlu2 %380 }
  0x73   : > { %v395_v45 = vmul.f32 %v1603_v41, %v381_v22  ;;  %v396_v15 = vmul.f32 %v1621_v5, %v381_v22 }
  0x7d   : > { %v1593_v24 = vpop.permute.xlu2 %301 }
  0x86   : > { %v377_v26 = vpop.permute.xlu2 %376 }
  0x87   : > { %v393_v54 = vmul.f32 %v1603_v41, %v377_v26  ;;  %v394_v16 = vmul.f32 %v1621_v5, %v377_v26 }
  0x8b   : > { %v307_v28 = vpop.permute.xlu1 %306  ;;  %v312_v29 = vpop.permute.xlu0 %311 }
  0x8c   : > { %v327_v39 = vmul.f32 %v1599_v36, %v312_v29  ;;  %v325_v50 = vmul.f32 %v1599_v36, %v307_v28  ;;  %v328_v2 = vmul.f32 %v1615_v0, %v312_v29  ;;  %v326_v11 = vmul.f32 %v1615_v0, %v307_v28 }
  0x8f   : > { %v1595_v32 = vpop.permute.xlu2 %330 }
  0x90   : > { %v351_v61 = vmul.f32 %v1597_v34, %v1595_v32 }
  0x94   : > { %v343_v37 = vpop.permute.xlu0 %342  ;;  %v339_v38 = vpop.permute.xlu1 %338 }
  0x95   : > { %v357_v40 = vmul.f32 %v1597_v34, %v343_v37  ;;  %v355_v46 = vmul.f32 %v1597_v34, %v339_v38  ;;  %v358_v3 = vmul.f32 %v1612_v60, %v343_v37  ;;  %v356_v7 = vmul.f32 %v1612_v60, %v339_v38 }
  0x96   : > { %v323_v37 = vmul.f32 %v1599_v36, %v1593_v24  ;;  %v324_v38 = vmul.f32 %v1615_v0, %v1593_v24 }
  0x97   : > { %v365_v44 = vadd.f32 %v357_v40, %v327_v39  ;;  %v363_v55 = vadd.f32 %v355_v46, %v325_v50  ;;  %v366_v12 = vadd.f32 %v358_v3, %v328_v2  ;;  %v364_v17 = vadd.f32 %v356_v7, %v326_v11 }
  0x98   : > { %v415_v42 = vpop.permute.xlu2 %414  ;;  %v352_v2 = vmul.f32 %v1612_v60, %v1595_v32 }
  0x99   : > { %v403_v52 = vadd.f32 %v395_v45, %v365_v44  ;;  %v431_v62 = vmul.f32 %v1607_v47, %v415_v42  ;;  %v401_v63 = vadd.f32 %v393_v54, %v363_v55  ;;  %v404_v21 = vadd.f32 %v396_v15, %v366_v12 }
  0x9a   : > { %v432_v22 = vmul.f32 %v1625_v13, %v415_v42  ;;  %v402_v26 = vadd.f32 %v394_v16, %v364_v17 }
  0x9b   : > { %v439_v6 = vadd.f32 %v431_v62, %v401_v63 }
  0x9c   : > { %v335_v48 = vpop.permute.xlu1 %334  ;;  %v440_v43 = vadd.f32 %v432_v22, %v402_v26 }
  0x9d   : > { %v419_v49 = vpop.permute.xlu0 %418  ;;  %v353_v29 = vmul.f32 %v1597_v34, %v335_v48  ;;  %v354_v30 = vmul.f32 %v1612_v60, %v335_v48 }
  0x9e   : > { %v433_v51 = vmul.f32 %v1607_v47, %v419_v49  ;;  %v434_v18 = vmul.f32 %v1625_v13, %v419_v49 }
  0x9f   : > { %v361_v45 = vadd.f32 %v353_v29, %v323_v37  ;;  %v362_v46 = vadd.f32 %v354_v30, %v324_v38 }
  0xa0   : > { %v441_v56 = vadd.f32 %v433_v51, %v403_v52  ;;  %v442_v25 = vadd.f32 %v434_v18, %v404_v21 }
  0xa1   : > { %v461_v58 = vpop.permute.xlu2 %460 }
  0xa2   : > { %v469_v59 = vadd.f32 %v461_v58, %v441_v56  ;;  %v470_v42 = vadd.f32 %v461_v58, %v442_v25 }
  0xa4   : > { %1338 = vtanh.f32 %v469_v59 }
  0xa5   : > { %v1617_v1 = vpop.permute.xlu1 %296 }
  0xa6   : > { %v369_v31 = vpop.permute.xlu0 %368  ;;  %v321_v3 = vmul.f32 %v1599_v36, %v1617_v1  ;;  %v322_v4 = vmul.f32 %v1615_v0, %v1617_v1 }
  0xa7   : > { %v389_v32 = vmul.f32 %v1603_v41, %v369_v31  ;;  %v390_v60 = vmul.f32 %v1621_v5, %v369_v31 }
  0xa8   : > { %v360_v11 = vadd.f32 %v352_v2, %v322_v4 }
  0xa9   : > { %v456_v8 = vpop.permute.xlu2 %455 }
  0xaa   : > { %v1339_v9 = vpop.eup %1338  ;;  %v467_v10 = vadd.f32 %v456_v8, %v439_v6  ;;  %v468_v48 = vadd.f32 %v456_v8, %v440_v43  ;;  %v509_v6 = vsel %vm507_vm0, %v479_v57, 0  ;;  %v398_v18 = vadd.f32 %v390_v60, %v360_v11 }
  0xab   : > { %v1627_v14 = vand.u32 4294901760, %v1339_v9 }
  0xac   : > { %1340 = vtanh.f32 %v467_v10  ;;  %v359_v10 = vadd.f32 %v351_v61, %v321_v3 }
  0xad   : > { %533 = vmatpush.msra.mxu0 %v1627_v14  ;;  %684 = vmatpush.msra.mxu3 %v1627_v14  ;;  %v1635_v19 = vsub.f32 %v1339_v9, %v1627_v14  ;;  %1342 = vtanh.f32 %v470_v42  ;;  %v1677_v9 = vand.u32 4294901760, %v509_v6 }
  0xae   : > { %v373_v20 = vpop.permute.xlu1 %372  ;;  %1344 = vtanh.f32 %v468_v48  ;;  %v397_v17 = vadd.f32 %v389_v32, %v359_v10 }
  0xaf   : > { %640 = vmatpush.msra.mxu2 %v1635_v19  ;;  %v587_v23 = vand.u32 4294901760, %v1635_v19  ;;  %v391_v39 = vmul.f32 %v1603_v41, %v373_v20  ;;  %v392_v40 = vmul.f32 %v1621_v5, %v373_v20  ;;  %v451_v58 = vpop.permute.xlu0 %450  ;;  %v1688_v16 = vsub.f32 %v509_v6, %v1677_v9  ;;  %v480_v41 = vld [vmem:[%s1898_s3 + $0x8] sm:$0xff] }
  0xb1   : > { %v588_v27 = vsub.f32 %v1635_v19, %v587_v23  ;;  %v399_v50 = vadd.f32 %v391_v39, %v361_v45  ;;  %v400_v51 = vadd.f32 %v392_v40, %v362_v46  ;;  %v1702_v26 = vand.u32 4294901760, %v1688_v16 }
  0xb2   : > { %v1341_v28 = vpop.eup %1340 }
  0xb3   : > { %v1645_v33 = vand.u32 4294901760, %v1341_v28  ;;  %v589_v35 = vand.u32 4294901760, %v588_v27  ;;  %v1343_v7 = vpop.eup %1342  ;;  %v543_v42 = vsub.f32 %v1688_v16, %v1702_v26 }
  0xb4   : > { %v1345_v34 = vpop.eup %1344  ;;  %v1681_v36 = vand.u32 4294901760, %v1343_v7 }
  0xb5   : > { %535 = vmatpush.msra.mxu0 %v1645_v33  ;;  %686 = vmatpush.msra.mxu3 %v1645_v33  ;;  %v1656_v44 = vsub.f32 %v1341_v28, %v1645_v33  ;;  %v1685_v15 = vand.u32 4294901760, %v1345_v34  ;;  %v512_v28 = vsel %vm507_vm0, %v480_v41, 0 }
  0xb6   : > { %590 = vmatpush.msra.mxu1 %v589_v35  ;;  %v1696_v21 = vsub.f32 %v1343_v7, %v1681_v36  ;;  %v1711_v39 = vand.u32 4294901760, %v512_v28 }
  0xb7   : > { %643 = vmatpush.msra.mxu2 %v1656_v44  ;;  %v411_v24 = vpop.permute.xlu1 %410  ;;  %v593_v49 = vand.u32 4294901760, %v1656_v44  ;;  %v1705_v27 = vsub.f32 %v1345_v34, %v1685_v15 }
  0xb8   : > { %v429_v52 = vmul.f32 %v1607_v47, %v411_v24  ;;  %v430_v53 = vmul.f32 %v1625_v13, %v411_v24  ;;  %v865_v38 = vand.u32 4294901760, %v1696_v21  ;;  %v1723_v48 = vsub.f32 %v512_v28, %v1711_v39  ;;  %v481_v24 = vld [vmem:[%s1898_s3 + $0x10] sm:$0xff] }
  0xb9   : > { %v594_v54 = vsub.f32 %v1656_v44, %v593_v49  ;;  %v871_v43 = vand.u32 4294901760, %v1705_v27 }
  0xba   : > { %v437_v55 = vadd.f32 %v429_v52, %v399_v50  ;;  %v438_v56 = vadd.f32 %v430_v53, %v400_v51  ;;  %v866_v46 = vsub.f32 %v1696_v21, %v865_v38  ;;  %v1728_v51 = vand.u32 4294901760, %v543_v42 }
  0xbb   : > { %v595_v59 = vand.u32 4294901760, %v594_v54  ;;  %v872_v52 = vsub.f32 %v1705_v27, %v871_v43 }
  0xbc   : > { %v465_v62 = vadd.f32 %v451_v58, %v437_v55  ;;  %v466_v63 = vadd.f32 %v451_v58, %v438_v56  ;;  %v515_v56 = vsel %vm507_vm0, %v481_v24, 0  ;;  %v867_v58 = vand.u32 4294901760, %v866_v46 }
  0xbd   : > { %596 = vmatpush.msra.mxu1 %v595_v59  ;;  %v1740_v59 = vand.u32 4294901760, %v1723_v48  ;;  %v1750_v3 = vand.u32 4294901760, %v515_v56 }
  0xbe   : > { %1346 = vtanh.f32 %v465_v62  ;;  %v873_v62 = vand.u32 4294901760, %v872_v52 }
  0xbf   : > { %v407_v8 = vpop.permute.xlu1 %406  ;;  %1348 = vtanh.f32 %v466_v63  ;;  %v551_v7 = vsub.f32 %v1723_v48, %v1740_v59  ;;  %v1765_v10 = vsub.f32 %v515_v56, %v1750_v3 }
  0xc0   : > { %v427_v0 = vmul.f32 %v1607_v47, %v407_v8  ;;  %v428_v1 = vmul.f32 %v1625_v13, %v407_v8  ;;  %v482_v8 = vld [vmem:[%s1898_s3 + $0x18] sm:$0xff] }
  0xc1   : > { %v518_v32 = vsel %vm507_vm0, %v482_v8, 0  ;;  %v552_v44 = vand.u32 4294901760, %v551_v7 }
  0xc2   : > { %v435_v47 = vadd.f32 %v427_v0, %v397_v17  ;;  %v436_v13 = vadd.f32 %v428_v1, %v398_v18  ;;  %v1773_v0 = vand.u32 4294901760, %v518_v32 }
  0xc4   : > { %v1347_v12 = vpop.eup %1346 }
  0xc5   : > { %v1690_v20 = vand.u32 4294901760, %v1347_v12  ;;  %v1349_v5 = vpop.eup %1348 }
  0xc6   : > { %v1708_v29 = vand.u32 4294901760, %v1349_v5 }
  0xc7   : > { %537 = vmatpush.msra.mxu0 %v1690_v20  ;;  %688 = vmatpush.msra.mxu3 %v1690_v20  ;;  %v598_v22 = vsub.f32 %v1347_v12, %v1690_v20  ;;  %v565_v12 = vsub.f32 %v518_v32, %v1773_v0 }
  0xc8   : > { %v446_v25 = vpop.permute.xlu1 %445  ;;  %v1717_v45 = vsub.f32 %v1349_v5, %v1708_v29 }
  0xc9   : > { %v463_v30 = vadd.f32 %v446_v25, %v435_v47  ;;  %v464_v31 = vadd.f32 %v446_v25, %v436_v13  ;;  %646 = vmatpush.msra.mxu2 %v598_v22  ;;  %v599_v35 = vand.u32 4294901760, %v598_v22  ;;  %v566_v17 = vand.u32 4294901760, %v565_v12 }
  0xca   : > { %v877_v53 = vand.u32 4294901760, %v1717_v45 }
  0xcb   : > { %1350 = vtanh.f32 %v463_v30  ;;  %v600_v37 = vsub.f32 %v598_v22, %v599_v35 }
  0xcc   : > { %1352 = vtanh.f32 %v464_v31  ;;  %v878_v63 = vsub.f32 %v1717_v45, %v877_v53 }
  0xcd   : > { %v601_v40 = vand.u32 4294901760, %v600_v37 }
  0xcf   : > { %602 = vmatpush.msra.mxu1 %v601_v40 }
  0xd0   : > { %v1838_v22 = vpop.permute.xlu1 %494 }
  0xd1   : > { %v1351_v50 = vpop.eup %1350 }
  0xd2   : > { %v1353_v54 = vpop.eup %1352  ;;  %v1734_v55 = vand.u32 4294901760, %v1351_v50 }
  0xd3   : > { %v1737_v57 = vand.u32 4294901760, %v1353_v54 }
  0xd4   : > { %539 = vmatpush.msra.mxu0 %v1734_v55  ;;  %690 = vmatpush.msra.mxu3 %v1734_v55  ;;  %v604_v61 = vsub.f32 %v1351_v50, %v1734_v55 }
  0xd5   : > { %545 = vmatmul.f32.vlgmr.msra.gmra.mxu0 %v1728_v51  ;;  %v882_v2 = vsub.f32 %v1353_v54, %v1737_v57  ;;  %694 = vmatmul.f32.vlgmr.msra.gmra.mxu3 %v1702_v26 }
  0xd6   : > { %868 = vmatpush.msrb.mxu3 %v867_v58  ;;  %731 = vmatpush.msrb.mxu0 %v587_v23  ;;  %v605_v4 = vand.u32 4294901760, %v604_v61  ;;  %v879_v23 = vand.u32 4294901760, %v878_v63 }
  0xd7   : > { %649 = vmatpush.msra.mxu2 %v604_v61  ;;  %v883_v6 = vand.u32 4294901760, %v882_v2 }
  0xd8   : > { %652 = vmatmul.f32.vlgmr.msra.gmra.mxu2 %v1688_v16  ;;  %874 = vmatpush.msrb.mxu3 %v873_v62  ;;  %v606_v19 = vsub.f32 %v604_v61, %v605_v4 }
  0xd9   : > { %735 = vmatpush.msrb.mxu0 %v593_v49  ;;  %811 = vmatpush.msrb.mxu2 %v1681_v36  ;;  %v884_v34 = vsub.f32 %v882_v2, %v883_v6  ;;  %v1771_v49 = vand.u32 4294901760, %v1765_v10 }
  0xda   : > { %v607_v11 = vand.u32 4294901760, %v606_v19  ;;  %880 = vmatpush.msrb.mxu3 %v879_v23 }
  0xdb   : > { %739 = vmatpush.msrb.mxu0 %v599_v35  ;;  %813 = vmatpush.msrb.mxu2 %v1685_v15  ;;  %v885_v60 = vand.u32 4294901760, %v884_v34  ;;  %v559_v1 = vsub.f32 %v1765_v10, %v1771_v49 }
  0xdc   : > { %608 = vmatpush.msra.mxu1 %v607_v11 }
  0xdd   : > { %743 = vmatpush.msrb.mxu0 %v605_v4  ;;  %815 = vmatpush.msrb.mxu2 %v1708_v29  ;;  %v505_v4 = vpop.permute.xlu0 %504 }
  0xde   : > { %886 = vmatpush.msrb.mxu3 %v885_v60  ;;  %610 = vmatmul.f32.vlgmr.msra.gmra.mxu1 %v1677_v9  ;;  %v1846_v60 = vpop.permute.xlu1 %1091 }
  0xdf   : > { %918 = vmatpush.msra.mxu0 %v1696_v21  ;;  %774 = vmatpush.msrb.mxu1 %v1627_v14  ;;  %v560_v14 = vand.u32 4294901760, %v559_v1 }
  0xe0   : > { %553 = vmatmul.f32.gmra.mxu0 %v552_v44  ;;  %817 = vmatpush.msrb.mxu2 %v1737_v57 }
  0xe1   : > { %1052 = vmatpush.msra.mxu3 %v1681_v36  ;;  %921 = vmatpush.msra.mxu0 %v1705_v27 }
  0xe2   : > { %1009 = vmatpush.msra.mxu2 %v865_v38  ;;  %776 = vmatpush.msrb.mxu1 %v1645_v33  ;;  %v567_v33 = vsub.f32 %v565_v12, %v566_v17 }
  0xe3   : > { %657 = vmatmul.f32.gmra.mxu2 %v1723_v48  ;;  %1054 = vmatpush.msra.mxu3 %v1685_v15 }
  0xe4   : > { %924 = vmatpush.msra.mxu0 %v1717_v45  ;;  %1013 = vmatpush.msra.mxu2 %v871_v43  ;;  %v568_v18 = vand.u32 4294901760, %v567_v33 }
  0xe5   : > { %700 = vmatmul.f32.gmra.mxu3 %v1740_v59  ;;  %778 = vmatpush.msrb.mxu1 %v1690_v20 }
  0xe6   : > { %1056 = vmatpush.msra.mxu3 %v1708_v29  ;;  %927 = vmatpush.msra.mxu0 %v882_v2 }
  0xe7   : > { %1017 = vmatpush.msra.mxu2 %v877_v53  ;;  %780 = vmatpush.msrb.mxu1 %v1734_v55 }
  0xe8   : > { %1058 = vmatpush.msra.mxu3 %v1737_v57  ;;  %561 = vmatmul.f32.gmra.mxu0 %v560_v14 }
  0xe9   : > { %962 = vmatpush.msra.mxu1 %v1681_v36  ;;  %1021 = vmatpush.msra.mxu2 %v883_v6  ;;  %v1835_v36 = vpop.permute.xlu2 %489 }
  0xea   : > { %614 = vmatmul.f32.gmra.mxu1 %v1711_v39 }
  0xeb   : > { %964 = vmatpush.msra.mxu1 %v1685_v15  ;;  %662 = vmatmul.f32.gmra.mxu2 %v1765_v10 }
  0xed   : > { %966 = vmatpush.msra.mxu1 %v1708_v29  ;;  %706 = vmatmul.f32.gmra.mxu3 %v1771_v49 }
  0xef   : > { %968 = vmatpush.msra.mxu1 %v1737_v57 }
  0xf0   : > { %569 = vmatmul.f32.gmra.mxu0 %v568_v18 }
  0xf1   : > { %v1841_v37 = vpop.permute.xlu2 %499 }
  0xf2   : > { %618 = vmatmul.f32.gmra.mxu1 %v1750_v3 }
  0xf3   : > { %667 = vmatmul.f32.gmra.mxu2 %v565_v12 }
  0xf5   : > { %712 = vmatmul.f32.gmra.mxu3 %v566_v17 }
  0xf8   : > { %745 = vmatmul.f32.vlgmr.msrb.gmra.mxu0 %v1677_v9 }
  0xf9   : > { %v1844_v19 = vpop.permute.xlu2 %1096 }
  0xfa   : > { %622 = vmatmul.f32.gmra.mxu1 %v1773_v0 }
  0xfb   : > { %823 = vmatmul.f32.vlgmr.msrb.gmra.mxu2 %v1728_v51 }
  0xfd   : > { %888 = vmatmul.f32.vlgmr.msrb.gmra.mxu3 %v1677_v9 }
 0x100   : > { %749 = vmatmul.f32.gmra.mxu0 %v1711_v39 }
 0x102   : > { %782 = vmatmul.f32.vlgmr.msrb.gmra.mxu1 %v1677_v9 }
 0x103   : > { %831 = vmatmul.f32.gmra.mxu2 %v552_v44 }
 0x105   : > { %892 = vmatmul.f32.gmra.mxu3 %v1711_v39 }
 0x108   : > { %753 = vmatmul.f32.gmra.mxu0 %v1750_v3 }
 0x10a   : > { %786 = vmatmul.f32.gmra.mxu1 %v1711_v39 }
 0x10b   : > { %839 = vmatmul.f32.gmra.mxu2 %v560_v14 }
 0x10d   : > { %896 = vmatmul.f32.gmra.mxu3 %v1750_v3 }
 0x110   : > { %757 = vmatmul.f32.gmra.mxu0 %v1773_v0 }
 0x112   : > { %790 = vmatmul.f32.gmra.mxu1 %v1750_v3 }
 0x113   : > { %847 = vmatmul.f32.gmra.mxu2 %v568_v18 }
 0x115   : > { %900 = vmatmul.f32.gmra.mxu3 %v1773_v0 }
 0x118   : > { %930 = vmatmul.f32.vlgmr.msra.gmra.mxu0 %v1688_v16 }
 0x11a   : > { %794 = vmatmul.f32.gmra.mxu1 %v1773_v0 }
 0x11b   : > { %1023 = vmatmul.f32.vlgmr.msra.gmra.mxu2 %v1677_v9 }
 0x11d   : > { %1060 = vmatmul.f32.vlgmr.msra.gmra.mxu3 %v1677_v9 }
 0x120   : > { %935 = vmatmul.f32.gmra.mxu0 %v1723_v48 }
 0x122   : > { %972 = vmatmul.f32.vlgmr.msra.gmra.mxu1 %v1702_v26 }
 0x123   : > { %1027 = vmatmul.f32.gmra.mxu2 %v1711_v39 }
 0x125   : > { %1064 = vmatmul.f32.gmra.mxu3 %v1711_v39 }
 0x128   : > { %940 = vmatmul.f32.gmra.mxu0 %v1765_v10 }
 0x12a   : > { %978 = vmatmul.f32.gmra.mxu1 %v1740_v59 }
 0x12b   : > { %1031 = vmatmul.f32.gmra.mxu2 %v1750_v3 }
 0x12d   : > { %1068 = vmatmul.f32.gmra.mxu3 %v1750_v3 }
 0x130   : > { %945 = vmatmul.f32.gmra.mxu0 %v565_v12 }
 0x132   : > { %984 = vmatmul.f32.gmra.mxu1 %v1771_v49 }
 0x133   : > { %1035 = vmatmul.f32.gmra.mxu2 %v1773_v0 }
 0x135   : > { %1072 = vmatmul.f32.gmra.mxu3 %v1773_v0 }
 0x13a   : > { %990 = vmatmul.f32.gmra.mxu1 %v566_v17 }
 0x152   : > { %v546_v9 = vpop.f32.mrf.mxu0 }
 0x153   : > { %v547_v15 = vadd.f32 %v546_v9, %v1835_v36 }
 0x158   : > { %v695_v21 = vpop.f32.mrf.mxu3 }
 0x15b   : > { %v611_v16 = vpop.f32.mrf.mxu1  ;;  %v653_v20 = vpop.f32.mrf.mxu2 }
 0x15c   : > { %v612_v5 = vadd.f32 %v611_v16, %v547_v15 }
 0x15d   : > { %v554_v41 = vpop.f32.mrf.mxu0 }
 0x15e   : > { %v654_v47 = vadd.f32 %v653_v20, %v612_v5  ;;  %v555_v25 = vadd.f32 %v554_v41, %v1838_v22  ;;  %v1850_v20 = vpop.permute.xlu0 %1101 }
 0x160   : > { %v696_v13 = vadd.f32 %v695_v21, %v654_v47 }
 0x165   : > { %v562_v27 = vpop.f32.mrf.mxu0 }
 0x166   : > { %v658_v26 = vpop.f32.mrf.mxu2  ;;  %v563_v38 = vadd.f32 %v562_v27, %v1841_v37 }
 0x167   : > { %v615_v28 = vpop.f32.mrf.mxu1 }
 0x168   : > { %v616_v29 = vadd.f32 %v615_v28, %v555_v25  ;;  %v701_v30 = vpop.f32.mrf.mxu3 }
 0x16a   : > { %v659_v31 = vadd.f32 %v658_v26, %v616_v29  ;;  %v1107_v29 = vpop.permute.xlu1 %1106 }
 0x16c   : > { %v702_v35 = vadd.f32 %v701_v30, %v659_v31 }
 0x16d   : > { %v570_v40 = vpop.f32.mrf.mxu0 }
 0x16e   : > { %v663_v39 = vpop.f32.mrf.mxu2  ;;  %v571_v6 = vadd.f32 %v570_v40, %v505_v4 }
 0x16f   : > { %v619_v42 = vpop.f32.mrf.mxu1 }
 0x170   : > { %v620_v43 = vadd.f32 %v619_v42, %v563_v38  ;;  %v707_v45 = vpop.f32.mrf.mxu3 }
 0x172   : > { %v664_v46 = vadd.f32 %v663_v39, %v620_v43 }
 0x174   : > { %v708_v48 = vadd.f32 %v707_v45, %v664_v46 }
 0x175   : > { %v746_v51 = vpop.f32.mrf.mxu0 }
 0x176   : > { %v668_v24 = vpop.f32.mrf.mxu2  ;;  %v747_v57 = vadd.f32 %v746_v51, %v696_v13 }
 0x177   : > { %v623_v50 = vpop.f32.mrf.mxu1 }
 0x178   : > { %v713_v52 = vpop.f32.mrf.mxu3  ;;  %v624_v7 = vadd.f32 %v623_v50, %v571_v6 }
 0x17a   : > { %v669_v44 = vadd.f32 %v668_v24, %v624_v7 }
 0x17c   : > { %v714_v17 = vadd.f32 %v713_v52, %v669_v44 }
 0x17d   : > { %v750_v54 = vpop.f32.mrf.mxu0 }
 0x17e   : > { %v824_v53 = vpop.f32.mrf.mxu2  ;;  %v751_v59 = vadd.f32 %v750_v54, %v702_v35 }
 0x17f   : > { %v783_v55 = vpop.f32.mrf.mxu1  ;;  %v825_v31 = vadd.f32 %v824_v53, %v1835_v36 }
 0x180   : > { %v889_v56 = vpop.f32.mrf.mxu3  ;;  %v784_v58 = vadd.f32 %v783_v55, %v747_v57 }
 0x181   : > { %v890_v40 = vadd.f32 %v889_v56, %v825_v31 }
 0x182   : > { %1354 = vtanh.f32 %v784_v58 }
 0x185   : > { %v754_v62 = vpop.f32.mrf.mxu0 }
 0x186   : > { %v832_v61 = vpop.f32.mrf.mxu2  ;;  %v755_v23 = vadd.f32 %v754_v62, %v708_v48 }
 0x187   : > { %v787_v63 = vpop.f32.mrf.mxu1  ;;  %v833_v30 = vadd.f32 %v832_v61, %v1838_v22 }
 0x188   : > { %v788_v2 = vadd.f32 %v787_v63, %v751_v59  ;;  %v893_v3 = vpop.f32.mrf.mxu3  ;;  %v1355_v8 = vpop.eup %1354 }
 0x189   : > { %v1109_v1 = vmul.f32 %v1355_v8, %v1846_v60  ;;  %v894_v38 = vadd.f32 %v893_v3, %v833_v30 }
 0x18a   : > { %1356 = vtanh.f32 %v788_v2 }
 0x18d   : > { %v758_v10 = vpop.f32.mrf.mxu0 }
 0x18e   : > { %v840_v34 = vpop.f32.mrf.mxu2  ;;  %v759_v33 = vadd.f32 %v758_v10, %v714_v17  ;;  %v1138_v17 = vpop.permute.xlu2 %1137 }
 0x18f   : > { %v791_v11 = vpop.f32.mrf.mxu1  ;;  %v841_v45 = vadd.f32 %v840_v34, %v1841_v37 }
 0x190   : > { %v1357_v32 = vpop.eup %1356  ;;  %v792_v49 = vadd.f32 %v791_v11, %v755_v23  ;;  %v897_v0 = vpop.f32.mrf.mxu3 }
 0x191   : > { %v1111_v12 = vmul.f32 %v1357_v32, %v1844_v19  ;;  %v898_v55 = vadd.f32 %v897_v0, %v841_v45 }
 0x192   : > { %1358 = vtanh.f32 %v792_v49 }
 0x193   : > { %v1117_v14 = vadd.f32 %v1111_v12, %v1109_v1 }
 0x195   : > { %v931_v15 = vpop.f32.mrf.mxu0 }
 0x196   : > { %v848_v18 = vpop.f32.mrf.mxu2  ;;  %v932_v24 = vadd.f32 %v931_v15, %v890_v40 }
 0x197   : > { %v795_v9 = vpop.f32.mrf.mxu1  ;;  %v849_v61 = vadd.f32 %v848_v18, %v505_v4 }
 0x198   : > { %v1359_v16 = vpop.eup %1358  ;;  %v796_v41 = vadd.f32 %v795_v9, %v759_v33  ;;  %v901_v5 = vpop.f32.mrf.mxu3  ;;  %v1140_v9 = vperm.slane %v1138_v17, 0 }
 0x199   : > { %v1113_v21 = vmul.f32 %v1359_v16, %v1850_v20  ;;  %v902_v7 = vadd.f32 %v901_v5, %v849_v61 }
 0x19a   : > { %1360 = vtanh.f32 %v796_v41 }
 0x19b   : > { %v1118_v47 = vadd.f32 %v1117_v14, %v1113_v21 }
 0x19d   : > { %v936_v25 = vpop.f32.mrf.mxu0 }
 0x19e   : > { %v1024_v13 = vpop.f32.mrf.mxu2  ;;  %v937_v46 = vadd.f32 %v936_v25, %v894_v38 }
 0x19f   : > { %v973_v26 = vpop.f32.mrf.mxu1 }
 0x1a0   : > { %v1361_v27 = vpop.eup %1360  ;;  %v1061_v28 = vpop.f32.mrf.mxu3  ;;  %v974_v54 = vadd.f32 %v973_v26, %v932_v24 }
 0x1a1   : > { %v1115_v35 = vmul.f32 %v1361_v27, %v1107_v29 }
 0x1a2   : > { %v1025_v53 = vadd.f32 %v1024_v13, %v974_v54 }
 0x1a3   : > { %v1119_v42 = vadd.f32 %v1118_v47, %v1115_v35 }
 0x1a4   : > { %v1062_v3 = vadd.f32 %v1061_v28, %v1025_v53 }
 0x1a5   : > { %v941_v50 = vpop.f32.mrf.mxu0  ;;  %v1120_v52 = vrot.slane %v1119_v42, 4 }
 0x1a6   : > { %v1028_v39 = vpop.f32.mrf.mxu2  ;;  %v942_v57 = vadd.f32 %v941_v50, %v898_v55 }
 0x1a7   : > { %v979_v43 = vpop.f32.mrf.mxu1  ;;  %v1121_v36 = vadd.f32 %v1120_v52, %v1119_v42 }
 0x1a8   : > { %v1065_v48 = vpop.f32.mrf.mxu3  ;;  %v980_v51 = vadd.f32 %v979_v43, %v937_v46 }
 0x1a9   : > { %v1122_v37 = vrot.slane %v1121_v36, 2 }
 0x1aa   : > { %v1029_v22 = vadd.f32 %v1028_v39, %v980_v51 }
 0x1ab   : > { %v1123_v34 = vadd.f32 %v1122_v37, %v1121_v36 }
 0x1ac   : > { %v1066_v63 = vadd.f32 %v1065_v48, %v1029_v22 }
 0x1ad   : > { %v946_v6 = vpop.f32.mrf.mxu0  ;;  %v1124_v4 = vrot.slane %v1123_v34, 1 }
 0x1ae   : > { %v1032_v58 = vpop.f32.mrf.mxu2  ;;  %1362 = vtanh.f32 %v1066_v63  ;;  %v947_v23 = vadd.f32 %v946_v6, %v902_v7  ;;  %v1185_v63 = vlaneseq }
 0x1af   : > { %v985_v59 = vpop.f32.mrf.mxu1  ;;  %1364 = vtanh.f32 %v1062_v3  ;;  %v1125_v33 = vadd.f32 %v1124_v4, %v1123_v34 }
 0x1b0   : > { %v986_v56 = vadd.f32 %v985_v59, %v942_v57  ;;  %v1069_v62 = vpop.f32.mrf.mxu3  ;;  %vm1187_vm6 = vcmp.lt.s32.totalorder %v1185_v63, 256 }
 0x1b1   : > { %v1141_v5 = vadd.f32 %v1140_v9, %v1125_v33 }
 0x1b2   : > { %v1033_v2 = vadd.f32 %v1032_v58, %v986_v56 }
 0x1b3   : > { %v1149_v26 = vand.u32 2147483647, %v1141_v5  ;;  %v1143_v61 = vmax.f32 %v1141_v5, 0.0  ;;  %vm1145_vm5 = vcmp.ne.f32.partialorder %v1141_v5, %v1141_v5 }
 0x1b4   : > { %v1070_v8 = vadd.f32 %v1069_v62, %v1033_v2  ;;  %v1363_v0 = vpop.eup %1362 }
 0x1b5   : > { %v1365_v12 = vpop.eup %1364  ;;  %v1112_v18 = vmul.f32 %v1363_v0, %v1844_v19  ;;  %v1151_v30 = vsub.f32 0.0, %v1149_v26 }
 0x1b6   : > { %v1036_v11 = vpop.f32.mrf.mxu2  ;;  %1366 = vtanh.f32 %v1070_v8  ;;  %v1110_v15 = vmul.f32 %v1365_v12, %v1846_v60 }
 0x1b7   : > { %v991_v10 = vpop.f32.mrf.mxu1  ;;  %v1153_v38 = vmul.f32 1.442695, %v1151_v30 }
 0x1b8   : > { %v992_v32 = vadd.f32 %v991_v10, %v947_v23  ;;  %v1073_v44 = vpop.f32.mrf.mxu3  ;;  %v1126_v41 = vadd.f32 %v1112_v18, %v1110_v15 }
 0x1ba   : > { %v1037_v49 = vadd.f32 %v1036_v11, %v992_v32 }
 0x1bc   : > { %v1074_v1 = vadd.f32 %v1073_v44, %v1037_v49  ;;  %v1367_v14 = vpop.eup %1366 }
 0x1bd   : > { %v1114_v16 = vmul.f32 %v1367_v14, %v1850_v20 }
 0x1be   : > { %1368 = vtanh.f32 %v1074_v1 }
 0x1bf   : > { %v1127_v47 = vadd.f32 %v1126_v41, %v1114_v16  ;;  %1370 = vpow2.f32 %v1153_v38 }
 0x1c4   : > { %v1369_v21 = vpop.eup %1368 }
 0x1c5   : > { %v1116_v13 = vmul.f32 %v1369_v21, %v1107_v29  ;;  %v1371_v20 = vpop.eup %1370 }
 0x1c6   : > { %v1157_v45 = vadd.f32 1.0, %v1371_v20  ;;  %v1160_v46 = vmul.f32 -0.5, %v1371_v20  ;;  %v1163_v52 = vand.u32 2147483647, %v1371_v20 }
 0x1c7   : > { %v1128_v25 = vadd.f32 %v1127_v47, %v1116_v13 }
 0x1c8   : > { %v1161_v51 = vadd.f32 1.0, %v1160_v46  ;;  %vm1164_vm1 = vcmp.lt.f32.partialorder %v1163_v52, 0.0004427343 }
 0x1c9   : > { %v1129_v27 = vrot.slane %v1128_v25, 4 }
 0x1ca   : > { %v1162_v22 = vmul.f32 %v1371_v20, %v1161_v51 }
 0x1cb   : > { %v1130_v28 = vadd.f32 %v1129_v27, %v1128_v25 }
 0x1cd   : > { %v1131_v31 = vrot.slane %v1130_v28, 2 }
 0x1cf   : > { %v1132_v35 = vadd.f32 %v1131_v31, %v1130_v28 }
 0x1d1   : > { %v1133_v39 = vrot.slane %v1132_v35, 1 }
 0x1d3   : > { %v1134_v19 = vadd.f32 %v1133_v39, %v1132_v35 }
 0x1d5   : > { %v1142_v60 = vadd.f32 %v1140_v9, %v1134_v19 }
 0x1d7   : > { %v1150_v40 = vand.u32 2147483647, %v1142_v60  ;;  %v1144_v56 = vmax.f32 %v1142_v60, 0.0  ;;  %vm1146_vm3 = vcmp.ne.f32.partialorder %v1142_v60, %v1142_v60 }
 0x1d9   : > { %v1152_v42 = vsub.f32 0.0, %v1150_v40 }
 0x1db   : > { %v1155_v43 = vmul.f32 1.442695, %v1152_v42 }
 0x1dd   : > { %1372 = vpow2.f32 %v1155_v43 }
 0x1de   : > { %1374 = vlog2.f32 %v1157_v45 }
 0x1e3   : > { %v1373_v29 = vpop.eup %1372 }
 0x1e4   : > { %v1166_v48 = vadd.f32 1.0, %v1373_v29  ;;  %v1169_v24 = vmul.f32 -0.5, %v1373_v29  ;;  %v1375_v50 = vpop.eup %1374  ;;  %v1172_v57 = vand.u32 2147483647, %v1373_v29 }
 0x1e5   : > { %v1159_v54 = vmul.f32 0.6931472, %v1375_v50 }
 0x1e6   : > { %1376 = vlog2.f32 %v1166_v48  ;;  %v1170_v55 = vadd.f32 1.0, %v1169_v24  ;;  %vm1173_vm2 = vcmp.lt.f32.partialorder %v1172_v57, 0.0004427343 }
 0x1e7   : > { %v1165_v36 = vsel %vm1164_vm1, %v1162_v22, %v1159_v54 }
 0x1e8   : > { %v1171_v59 = vmul.f32 %v1373_v29, %v1170_v55  ;;  %v1175_v2 = vadd.f32 %v1165_v36, %v1143_v61 }
 0x1ea   : > { %v1177_v7 = vsel %vm1145_vm5, %v1141_v5, %v1175_v2 }
 0x1ec   : > { %v1377_v58 = vpop.eup %1376 }
 0x1ed   : > { %v1168_v53 = vmul.f32 0.6931472, %v1377_v58 }
 0x1ef   : > { %v1174_v62 = vsel %vm1173_vm2, %v1171_v59, %v1168_v53 }
 0x1f0   : > { %v1176_v37 = vadd.f32 %v1174_v62, %v1144_v56 }
 0x1f2   : > { %v1178_v3 = vsel %vm1146_vm3, %v1142_v60, %v1176_v37 }
 0x1f3   : > { %v1181_v6 = vrot.slane %v1178_v3, 7 }
 0x1f5   : > { %v1183_v8 = vsel %vm1182_vm4, %v1177_v7, %v1181_v6 }
 0x1f6   : > { %1189 = vst.msk [vmem:[%s274_s20] sm:$0x3] %vm1187_vm6, %v1183_v8 }
 0x1f7   : > { %1405 = shalt.err (!%p1402_p3)
}
 0x1f8   : > { %1276 = dma.vmem_to_hbm [thread:$0]  (%p1526_p5), %s1204_s21, 32, %s1206_s6, %s1191_s16  }
 0x1f9 PF: > { %p1282_p4 = scmp.ge.s32.totalorder %s1440_s29, 2  ;;  %s1217_s14 = sand.u32 1, %s1428_s26  }
 0x1fa   : > { %s1218_s15 = scalar_lea.sflag [#allocation4], %s1217_s14 }
 0x1fb   : > { %p1279_p7 = pnand %p1282_p4, %p1530_p6 }
 0x1fd   : > { %p1280_p8 = pneg %p1279_p7 }
 0x1ff   : > { %1423 = dma.done.wait (%p1280_p8), %s1218_s15, 32  }
 0x200   : > { %1425 = vsyncadd (%p1280_p8), %s1218_s15, 4294967264  ;;  %p19_p9 = scmp.ge.s32.totalorder %s1512_s8, 4   ;;  %s1905_s26 = smov %s1432_s27 }
 0x201   : > { %s1906_s27 = smov %s1436_s28  ;;  %s1907_s28 = smov %s1524_s11 }
 0x202   : > { %s1908_s29 = smov %s1512_s8  ;;  %21 = sbr.rel (!%p19_p9) target bundleno = 6 (0x6), region = 83 }
 0x207   :  { %1224 = vsyncpa [#allocation4], 1 }
 0x208   :  { %1226 = vsyncpa [#allocation4 + $0x1], 1 }

</bundles_post_ra>
